<compile_context>
chip_gen: v5e
topology: v5e:2x2
jax: 0.10.0
libtpu: 0.0.40
codegen_flags: <defaults>
</compile_context>

<pallas_src>
import functools
import math

import jax
import jax.numpy as jnp
from jax import lax
from jax.experimental import pallas as pl
from jax.experimental.pallas import tpu as pltpu


def _arcface_kernel(label_ref, cos_ref, out_ref, *, s, cos_m, sin_m):
    x = cos_ref[...].astype(jnp.float32)                # (tn, tc), math in f32
    tn, tc = x.shape
    # Shift the resident (tn, 1) label column into this tile's local class
    # frame once, then compare against a loop-invariant lane iota.
    local_lab = label_ref[...] - pl.program_id(1) * tc  # (tn, 1) i32
    col = lax.broadcasted_iota(jnp.int32, (tn, tc), 1)  # lane index, >= 0
    # label == -1 rows can never match (local_lab < 0 there): no extra mask.
    hit = col == local_lab                              # (tn, tc) one-hot mask
    # cos(acos(x) + m) via identity; clamp radicand for fp-safety at |x|==1.
    margined = x * cos_m - sin_m * jnp.sqrt(jnp.maximum(1.0 - x * x, 0.0))
    out_ref[...] = (s * jnp.where(hit, margined, x)).astype(out_ref.dtype)


def _pick_tile(total, target, quantum):
    """Largest tile <= target that divides `total` and is a multiple of
    `quantum`, falling back to the full axis (always a legal block)."""
    if total <= target:
        return total
    t = (target // quantum) * quantum
    while t >= quantum:
        if total % t == 0:
            return t
        t -= quantum
    return total


def arcface_forward(cosine, label, s=64.0, m=0.5, block_n=None, block_c=None,
                    vmem_limit_bytes=48 * 1024 * 1024):
    """cosine: (N, C) float, label: (N,) int (-1 means 'no label')."""
    n, c = cosine.shape
    tn = block_n if block_n is not None else _pick_tile(n, 512, 8)
    tc = block_c if block_c is not None else _pick_tile(c, 2048, 128)
    assert n % tn == 0 and c % tc == 0, "tile must divide (N, C)"

    label2d = label.reshape(n, 1).astype(jnp.int32)

    kernel = functools.partial(
        _arcface_kernel, s=float(s), cos_m=math.cos(m), sin_m=math.sin(m)
    )

    return pl.pallas_call(
        kernel,
        out_shape=jax.ShapeDtypeStruct((n, c), cosine.dtype),
        grid=(n // tn, c // tc),                      # class axis innermost
        in_specs=[
            # Labels: same block for every class tile -> stays resident.
            pl.BlockSpec((tn, 1), lambda i, j: (i, 0)),
            pl.BlockSpec((tn, tc), lambda i, j: (i, j)),
        ],
        out_specs=pl.BlockSpec((tn, tc), lambda i, j: (i, j)),
        compiler_params=pltpu.CompilerParams(
            dimension_semantics=("parallel", "parallel"),
            vmem_limit_bytes=vmem_limit_bytes,
        ),
    )(label2d, cosine)


def _reference(cosine, label, s=64.0, m=0.5):
    """Plain-JAX mirror of the PyTorch forward (for verification)."""
    n, c = cosine.shape
    valid = (label != -1)[:, None]
    one_hot = jax.nn.one_hot(jnp.clip(label, 0, c - 1), c, dtype=jnp.float32)
    m_hot = jnp.where(valid, one_hot * m, 0.0)
    theta = jnp.arccos(cosine.astype(jnp.float32)) + m_hot
    return (jnp.cos(theta) * s).astype(cosine.dtype)


if __name__ == "__main__":
    key = jax.random.PRNGKey(0)
    k1, k2, k3 = jax.random.split(key, 3)

    N, C = 32, 256  # small synthetic shapes: 32 samples, 256 classes
    cosine = jax.random.uniform(k1, (N, C), jnp.float32, minval=-0.999, maxval=0.999)
    label = jax.random.randint(k2, (N,), 0, C, dtype=jnp.int32)
    # mark a few rows as unlabeled (-1), like the torch `label != -1` filter
    drop = jax.random.bernoulli(k3, 0.25, (N,))
    label = jnp.where(drop, jnp.int32(-1), label)

    ref = _reference(cosine, label)

    # Default (auto-picked, large-tile) path: single big tile at these shapes.
    out = jax.block_until_ready(arcface_forward(cosine, label))
    assert jnp.allclose(out, ref, rtol=1e-4, atol=1e-3), "mismatch (auto tiles)"

    # Explicit small tiles to exercise the 2D grid / class-tiled index math.
    out_tiled = jax.block_until_ready(
        arcface_forward(cosine, label, block_n=8, block_c=128))
    assert jnp.allclose(out_tiled, ref, rtol=1e-4, atol=1e-3), "mismatch (2D grid)"

    print("KERNEL_OK")
</pallas_src>

<mosaic_0001>
module attributes {stable_mosaic.version = 11 : i64} {
  func.func @_arcface_kernel(%arg0: i32, %arg1: i32, %arg2: memref<32x1xi32, #tpu.memory_space<vmem>>, %arg3: memref<32x256xf32, #tpu.memory_space<vmem>>, %arg4: memref<32x256xf32, #tpu.memory_space<vmem>>) attributes {dimension_semantics = [#tpu.dimension_semantics<parallel>, #tpu.dimension_semantics<parallel>], iteration_bounds = array<i64: 1, 1>, scalar_prefetch = 0 : i64, scratch_operands = 0 : i64, tpu.core_type = #tpu.core_type<tc>, window_params = [{transform_indices = @transform_0, window_bounds = array<i64: 32, 1>}, {transform_indices = @transform_1, window_bounds = array<i64: 32, 256>}, {transform_indices = @transform_2, window_bounds = array<i64: 32, 256>}]} {
    %c0 = arith.constant 0 : index
    %c0_0 = arith.constant 0 : index
    %0 = vector.load %arg3[%c0, %c0_0] : memref<32x256xf32, #tpu.memory_space<vmem>>, vector<32x256xf32>
    %c0_1 = arith.constant 0 : index
    %c0_2 = arith.constant 0 : index
    %1 = vector.load %arg2[%c0_1, %c0_2] : memref<32x1xi32, #tpu.memory_space<vmem>>, vector<32x1xi32>
    %c256_i32 = arith.constant 256 : i32
    %2 = arith.muli %arg1, %c256_i32 : i32
    %3 = vector.broadcast %2 : i32 to vector<32x1xi32>
    %4 = arith.subi %1, %3 : vector<32x1xi32>
    %5 = tpu.iota {dimensions = array<i32: 1>} : vector<32x256xi32>
    %6 = vector.broadcast %4 : vector<32x1xi32> to vector<32x256xi32>
    %7 = arith.cmpi eq, %5, %6 : vector<32x256xi32>
    %cst = arith.constant 0.87758255 : f32
    %8 = vector.broadcast %cst : f32 to vector<32x256xf32>
    %9 = arith.mulf %0, %8 : vector<32x256xf32>
    %10 = arith.mulf %0, %0 : vector<32x256xf32>
    %cst_3 = arith.constant 1.000000e+00 : f32
    %11 = vector.broadcast %cst_3 : f32 to vector<32x256xf32>
    %12 = arith.subf %11, %10 : vector<32x256xf32>
    %cst_4 = arith.constant 0.000000e+00 : f32
    %13 = vector.broadcast %cst_4 : f32 to vector<32x256xf32>
    %14 = arith.maximumf %12, %13 : vector<32x256xf32>
    %15 = math.sqrt %14 : vector<32x256xf32>
    %cst_5 = arith.constant 0.47942555 : f32
    %16 = vector.broadcast %cst_5 : f32 to vector<32x256xf32>
    %17 = arith.mulf %16, %15 : vector<32x256xf32>
    %18 = arith.subf %9, %17 : vector<32x256xf32>
    %19 = arith.select %7, %18, %0 : vector<32x256xi1>, vector<32x256xf32>
    %cst_6 = arith.constant 6.400000e+01 : f32
    %20 = vector.broadcast %cst_6 : f32 to vector<32x256xf32>
    %21 = arith.mulf %20, %19 : vector<32x256xf32>
    %c0_7 = arith.constant 0 : index
    %c0_8 = arith.constant 0 : index
    %22 = vector.load %arg4[%c0_7, %c0_8] : memref<32x256xf32, #tpu.memory_space<vmem>>, vector<32x256xf32>
    tpu.vector_store %arg4[%c0_7, %c0_8], %21 {strides = array<i32>} : memref<32x256xf32, #tpu.memory_space<vmem>>, vector<32x256xf32>,
    return
  }
  func.func @transform_0(%arg0: i32, %arg1: i32) -> (i32, i32) {
    %c0_i32 = arith.constant 0 : i32
    %c0_i32_0 = arith.constant 0 : i32
    return %arg0, %c0_i32 : i32, i32
  }
  func.func @transform_1(%arg0: i32, %arg1: i32) -> (i32, i32) {
    %c0_i32 = arith.constant 0 : i32
    return %arg0, %arg1 : i32, i32
  }
  func.func @transform_2(%arg0: i32, %arg1: i32) -> (i32, i32) {
    %c0_i32 = arith.constant 0 : i32
    return %arg0, %arg1 : i32, i32
  }
}

</mosaic_0001>

<bundles_post_ra>
// kernel: tpu_custom_call.1
= control target key start
LH: loop header
LB: loop body
LE: loop exit
PB: predicated region body
PF: predicated region fallthrough
CT: control target
= control target key end

     0   :  { %7 = vsyncpa [#allocation3], 0  ;;  %s504_s0 = inlined_call_operand.vmem [shape: s32[32,1], index: 0, kind: input, shape index: {}]   ;;  %s505_s1 = inlined_call_operand.hbm [shape: f32[32,256], index: 1, kind: input, shape index: {}]   ;;  %s506_s2 = inlined_call_operand.hbm [shape: f32[32,256], index: 2, kind: output, shape index: {}]  }
   0x1   :  { %8 = vsyncpa [#allocation4], 0  ;;  %s15_s11 = sshll.u32 %s505_s1, 4  ;;  %s331_s12 = smov [#allocation2]   ;;  %s16_s11 = int_to_ptr.hbm [resolvable:$true] %s15_s11 }
   0x2   :  { %s17_s13 = sshll.u32 %s331_s12, 4  ;;  %s332_s14 = smov 256   ;;  %s18_s13 = int_to_ptr.vmem [resolvable:$true] %s17_s13 }
   0x3   :  { %s333_s15 = smov 16  }
   0x4   :  { %23 = dma.hbm_to_vmem [thread:$0]  %s16_s11, 1024, %s18_s13, [#allocation3], %s332_s14, %s332_s14, %s333_s15  }
   0x5   :  { %327 = dma.done.wait [#allocation3], 1024  }
   0x6   :  { %328 = vsyncadd [#allocation3], 4294966272  ;;  %v334_v0 = vmov 0   ;;  %v38_v1 = vld [vmem:[%s504_s0 + $0x10] sm:$0xff]  ;;  %v36_v2 = vld [vmem:[%s504_s0] sm:$0xff]  ;;  %s243_s26 = sshll.u32 %s506_s2, 4  ;;  %s244_s26 = int_to_ptr.hbm [resolvable:$true] %s243_s26 }
   0x7   :  { %262 = vset.pattern.permute.xlu1 %v334_v0  ;;  %261 = vset.pattern.permute.xlu0 %v334_v0  ;;  %v39_v3 = vld [vmem:[%s504_s0 + $0x18] sm:$0xff]  ;;  %v37_v4 = vld [vmem:[%s504_s0 + $0x8] sm:$0xff]  ;;  %v369_v5 = vld [vmem:[#allocation2 + $0x20] sm:$0xff]  ;;  %s335_s0 = smov [#allocation5]  }
   0x8   :  { %56 = vperm.xlu1 %262, %v38_v1   ;;  %50 = vperm.xlu0 %261, %v36_v2   ;;  %v371_v6 = vld [vmem:[#allocation2 + $0x28] sm:$0xff]  ;;  %v81_v7 = vmul.f32 %v369_v5, %v369_v5  ;;  %v377_v9 = vld [vmem:[#allocation2] sm:$0xff]  ;;  %v395_v21 = vld [vmem:[#allocation2 + $0x30] sm:$0xff]  ;;  %s241_s23 = sshll.u32 %s335_s0, 4  ;;  %s242_s23 = int_to_ptr.vmem [resolvable:$true] %s241_s23 }
   0x9   :  { %v82_v8 = vmul.f32 %v371_v6, %v371_v6  ;;  %v379_v10 = vld [vmem:[#allocation2 + $0x8] sm:$0xff]  ;;  %v77_v11 = vmul.f32 %v377_v9, %v377_v9  ;;  %v397_v22 = vld [vmem:[#allocation2 + $0x38] sm:$0xff]  ;;  %v399_v23 = vld [vmem:[#allocation2 + $0x10] sm:$0xff]  ;;  %v83_v24 = vmul.f32 %v395_v21, %v395_v21 }
   0xa   :  { %v78_v12 = vmul.f32 %v379_v10, %v379_v10  ;;  %v89_v13 = vsub.f32 1.0, %v81_v7  ;;  %v84_v25 = vmul.f32 %v397_v22, %v397_v22  ;;  %v406_v26 = vld [vmem:[#allocation2 + $0x18] sm:$0xff]  ;;  %v79_v27 = vmul.f32 %v399_v23, %v399_v23 }
   0xb   :  { %v90_v14 = vsub.f32 1.0, %v82_v8  ;;  %v85_v15 = vsub.f32 1.0, %v77_v11  ;;  %v80_v28 = vmul.f32 %v406_v26, %v406_v26  ;;  %v91_v30 = vsub.f32 1.0, %v83_v24 }
   0xc   :  { %v385_v16 = vmax.f32 %v89_v13, 0.0  ;;  %v86_v18 = vsub.f32 1.0, %v78_v12  ;;  %v92_v31 = vsub.f32 1.0, %v84_v25  ;;  %v87_v32 = vsub.f32 1.0, %v79_v27 }
   0xd   :  { %v387_v17 = vmax.f32 %v90_v14, 0.0  ;;  %v390_v19 = vmax.f32 %v85_v15, 0.0  ;;  %v88_v34 = vsub.f32 1.0, %v80_v28  ;;  %v414_v36 = vmax.f32 %v91_v30, 0.0 }
   0xe   :  { %263 = vrsqrt.f32 %v385_v16  ;;  %v393_v20 = vmax.f32 %v86_v18, 0.0  ;;  %v416_v38 = vmax.f32 %v92_v31, 0.0  ;;  %v419_v40 = vmax.f32 %v87_v32, 0.0 }
   0xf   :  { %265 = vrsqrt.f32 %v387_v17  ;;  %v421_v42 = vmax.f32 %v88_v34, 0.0  ;;  %vm156_vm0 = vcmp.eq.f32.partialorder %v385_v16, inf  ;;  %vm168_vm1 = vcmp.eq.f32.partialorder %v387_v17, inf }
  0x10   :  { %59 = vperm.xlu1 %262, %v39_v3   ;;  %53 = vperm.xlu0 %261, %v37_v4   ;;  %267 = vrsqrt.f32 %v390_v19  ;;  %v159_v27 = vand.u32 2147483648, %v385_v16  ;;  %vm158_vm2 = vcmp.eq.f32.partialorder %v385_v16, 0.0  ;;  %vm170_vm3 = vcmp.eq.f32.partialorder %v387_v17, 0.0 }
  0x11   :  { %269 = vrsqrt.f32 %v393_v20  ;;  %v171_v30 = vand.u32 2147483648, %v387_v17  ;;  %vm108_vm4 = vcmp.eq.f32.partialorder %v390_v19, inf  ;;  %v111_v32 = vand.u32 2147483648, %v390_v19 }
  0x12   :  { %271 = vrsqrt.f32 %v414_v36  ;;  %vm120_vm5 = vcmp.eq.f32.partialorder %v393_v20, inf  ;;  %vm110_vm6 = vcmp.eq.f32.partialorder %v390_v19, 0.0  ;;  %vm122_vm7 = vcmp.eq.f32.partialorder %v393_v20, 0.0 }
  0x13   :  { %273 = vrsqrt.f32 %v416_v38  ;;  %vm180_vm8 = vcmp.eq.f32.partialorder %v414_v36, inf  ;;  %vm192_vm9 = vcmp.eq.f32.partialorder %v416_v38, inf  ;;  %vm132_vm10 = vcmp.eq.f32.partialorder %v419_v40, inf }
  0x14   :  { %v264_v29 = vpop.eup %263  ;;  %275 = vrsqrt.f32 %v419_v40  ;;  %vm144_vm11 = vcmp.eq.f32.partialorder %v421_v42, inf  ;;  %vm182_vm12 = vcmp.eq.f32.partialorder %v414_v36, 0.0  ;;  %vm194_vm13 = vcmp.eq.f32.partialorder %v416_v38, 0.0 }
  0x15   :  { %v266_v33 = vpop.eup %265  ;;  %v150_v35 = vmul.f32 %v264_v29, %v385_v16  ;;  %277 = vrsqrt.f32 %v421_v42  ;;  %vm134_vm14 = vcmp.eq.f32.partialorder %v419_v40, 0.0  ;;  %vm146_vm15 = vcmp.eq.f32.partialorder %v421_v42, 0.0 }
  0x16   :  { %v268_v37 = vpop.eup %267  ;;  %v162_v39 = vmul.f32 %v266_v33, %v387_v17 }
  0x17   :  { %v270_v41 = vpop.eup %269  ;;  %v151_v43 = vmul.f32 %v264_v29, %v150_v35  ;;  %v102_v44 = vmul.f32 %v268_v37, %v390_v19 }
  0x18   :  { %v163_v45 = vmul.f32 %v266_v33, %v162_v39  ;;  %v114_v46 = vmul.f32 %v270_v41, %v393_v20  ;;  %v272_v49 = vpop.eup %271 }
  0x19   :  { %v152_v47 = vmul.f32 0.5, %v151_v43  ;;  %v103_v48 = vmul.f32 %v268_v37, %v102_v44  ;;  %v274_v52 = vpop.eup %273  ;;  %v174_v59 = vmul.f32 %v272_v49, %v414_v36  ;;  %v123_v44 = vand.u32 2147483648, %v393_v20 }
  0x1a   :  { %v164_v50 = vmul.f32 0.5, %v163_v45  ;;  %v115_v51 = vmul.f32 %v270_v41, %v114_v46  ;;  %v276_v53 = vpop.eup %275  ;;  %v186_v60 = vmul.f32 %v274_v52, %v416_v38 }
  0x1b   :  { %v153_v54 = vsub.f32 1.5, %v152_v47  ;;  %v104_v55 = vmul.f32 0.5, %v103_v48  ;;  %v278_v56 = vpop.eup %277  ;;  %v126_v63 = vmul.f32 %v276_v53, %v419_v40  ;;  %v175_v3 = vmul.f32 %v272_v49, %v174_v59 }
  0x1c   :  { %v165_v57 = vsub.f32 1.5, %v164_v50  ;;  %v116_v58 = vmul.f32 0.5, %v115_v51  ;;  %v138_v0 = vmul.f32 %v278_v56, %v421_v42  ;;  %v187_v4 = vmul.f32 %v274_v52, %v186_v60 }
  0x1d   :  { %v154_v61 = vmul.f32 %v264_v29, %v153_v54  ;;  %v105_v62 = vsub.f32 1.5, %v104_v55  ;;  %v127_v7 = vmul.f32 %v276_v53, %v126_v63  ;;  %v176_v15 = vmul.f32 0.5, %v175_v3 }
  0x1e   :  { %v166_v1 = vmul.f32 %v266_v33, %v165_v57  ;;  %v117_v2 = vsub.f32 1.5, %v116_v58  ;;  %v139_v12 = vmul.f32 %v278_v56, %v138_v0  ;;  %v188_v18 = vmul.f32 0.5, %v187_v4 }
  0x1f   :  { %v155_v8 = vmul.f32 %v154_v61, %v385_v16  ;;  %v106_v11 = vmul.f32 %v268_v37, %v105_v62  ;;  %v128_v24 = vmul.f32 0.5, %v127_v7  ;;  %v177_v34 = vsub.f32 1.5, %v176_v15 }
  0x20   :  { %v167_v13 = vmul.f32 %v166_v1, %v387_v17  ;;  %v118_v14 = vmul.f32 %v270_v41, %v117_v2  ;;  %v140_v29 = vmul.f32 0.5, %v139_v12  ;;  %v189_v35 = vsub.f32 1.5, %v188_v18 }
  0x21   :  { %v157_v25 = vsel %vm156_vm0, %v385_v16, %v155_v8  ;;  %v107_v28 = vmul.f32 %v106_v11, %v390_v19  ;;  %v129_v37 = vsub.f32 1.5, %v128_v24  ;;  %v46_v41 = vlaneseq }
  0x22   :  { %v169_v31 = vsel %vm168_vm1, %v387_v17, %v167_v13  ;;  %v119_v33 = vmul.f32 %v118_v14, %v393_v20  ;;  %v141_v39 = vsub.f32 1.5, %v140_v29  ;;  %v160_v43 = vsel %vm158_vm2, %v159_v27, %v157_v25 }
  0x23   :  { %v109_v16 = vsel %vm108_vm4, %v390_v19, %v107_v28  ;;  %v172_v45 = vsel %vm170_vm3, %v171_v30, %v169_v31  ;;  %v178_v47 = vmul.f32 %v272_v49, %v177_v34  ;;  %v190_v50 = vmul.f32 %v274_v52, %v189_v35 }
  0x24   :  { %v121_v46 = vsel %vm120_vm5, %v393_v20, %v119_v33  ;;  %v112_v48 = vsel %vm110_vm6, %v111_v32, %v109_v16  ;;  %v130_v51 = vmul.f32 %v276_v53, %v129_v37  ;;  %v142_v54 = vmul.f32 %v278_v56, %v141_v39 }
  0x25   :  { %v455_v55 = vand.u32 127, %v46_v41  ;;  %v73_v57 = vmul.f32 0.87758255, %v369_v5  ;;  %v74_v19 = vmul.f32 0.87758255, %v371_v6  ;;  %v124_v60 = vsel %vm122_vm7, %v123_v44, %v121_v46 }
  0x26   :  { %v201_v58 = vmul.f32 0.47942555, %v160_v43  ;;  %v202_v59 = vmul.f32 0.47942555, %v172_v45  ;;  %v69_v17 = vmul.f32 0.87758255, %v377_v9  ;;  %v179_v20 = vmul.f32 %v178_v47, %v414_v36 }
  0x27   :  { %v70_v61 = vmul.f32 0.87758255, %v379_v10  ;;  %v197_v62 = vmul.f32 0.47942555, %v112_v48  ;;  %v191_v49 = vmul.f32 %v190_v50, %v416_v38  ;;  %v131_v52 = vmul.f32 %v130_v51, %v419_v40 }
  0x28   :  { %v143_v53 = vmul.f32 %v142_v54, %v421_v42  ;;  %v198_v56 = vmul.f32 0.47942555, %v124_v60  ;;  %v183_v63 = vand.u32 2147483648, %v414_v36  ;;  %v195_v0 = vand.u32 2147483648, %v416_v38 }
  0x29   :  { %v181_v1 = vsel %vm180_vm8, %v414_v36, %v179_v20  ;;  %v135_v2 = vand.u32 2147483648, %v419_v40  ;;  %v147_v3 = vand.u32 2147483648, %v421_v42  ;;  %v193_v4 = vsel %vm192_vm9, %v416_v38, %v191_v49 }
  0x2a   :  { %v133_v7 = vsel %vm132_vm10, %v419_v40, %v131_v52  ;;  %v145_v8 = vsel %vm144_vm11, %v421_v42, %v143_v53  ;;  %v48_v11 = vadd.s32 128, %v455_v55  ;;  %v209_v12 = vsub.f32 %v73_v57, %v201_v58 }
  0x2b   :  { %v184_v13 = vsel %vm182_vm12, %v183_v63, %v181_v1  ;;  %v210_v14 = vsub.f32 %v74_v19, %v202_v59  ;;  %v196_v36 = vsel %vm194_vm13, %v195_v0, %v193_v4  ;;  %v136_v15 = vsel %vm134_vm14, %v135_v2, %v133_v7 }
  0x2c   :  { %v148_v18 = vsel %vm146_vm15, %v147_v3, %v145_v8  ;;  %v205_v24 = vsub.f32 %v69_v17, %v197_v62  ;;  %v206_v25 = vsub.f32 %v70_v61, %v198_v56  ;;  %v75_v27 = vmul.f32 0.87758255, %v395_v21 }
  0x2d   :  { %v76_v38 = vmul.f32 0.87758255, %v397_v22  ;;  %v203_v28 = vmul.f32 0.47942555, %v184_v13  ;;  %v71_v40 = vmul.f32 0.87758255, %v399_v23 }
  0x2e   :  { %v72_v29 = vmul.f32 0.87758255, %v406_v26  ;;  %v204_v31 = vmul.f32 0.47942555, %v196_v36  ;;  %v199_v32 = vmul.f32 0.47942555, %v136_v15 }
  0x2f   :  { %v200_v33 = vmul.f32 0.47942555, %v148_v18  ;;  %v211_v45 = vsub.f32 %v75_v27, %v203_v28 }
  0x30   :  { %v212_v46 = vsub.f32 %v76_v38, %v204_v31  ;;  %v207_v47 = vsub.f32 %v71_v40, %v199_v32 }
  0x31   :  { %v208_v48 = vsub.f32 %v72_v29, %v200_v33 }
  0x7a   :  { %v57_v42 = vpop.permute.xlu1 %56  ;;  %v51_v30 = vpop.permute.xlu0 %50 }
  0x7b   :  { %vm65_vm0 = vcmp.eq.s32.totalorder %v455_v55, %v57_v42  ;;  %vm66_vm1 = vcmp.eq.s32.totalorder %v48_v11, %v57_v42  ;;  %vm61_vm2 = vcmp.eq.s32.totalorder %v455_v55, %v51_v30  ;;  %vm62_vm3 = vcmp.eq.s32.totalorder %v48_v11, %v51_v30 }
  0x7c   :  { %v217_v34 = vsel %vm65_vm0, %v209_v12, %v369_v5  ;;  %v218_v35 = vsel %vm66_vm1, %v210_v14, %v371_v6  ;;  %v213_v37 = vsel %vm61_vm2, %v205_v24, %v377_v9  ;;  %v214_v39 = vsel %vm62_vm3, %v206_v25, %v379_v10 }
  0x7d   :  { %v225_v41 = vmul.f32 64.0, %v217_v34  ;;  %v226_v16 = vmul.f32 64.0, %v218_v35  ;;  %v221_v43 = vmul.f32 64.0, %v213_v37  ;;  %v222_v44 = vmul.f32 64.0, %v214_v39 }
  0x7f   :  { %233 = vst [vmem:[#allocation5 + $0x20] sm:$0xff] %v225_v41 }
  0x80   :  { %234 = vst [vmem:[#allocation5 + $0x28] sm:$0xff] %v226_v16 }
  0x81   :  { %229 = vst [vmem:[#allocation5] sm:$0xff] %v221_v43 }
  0x82   :  { %230 = vst [vmem:[#allocation5 + $0x8] sm:$0xff] %v222_v44  ;;  %v60_v50 = vpop.permute.xlu1 %59  ;;  %v54_v5 = vpop.permute.xlu0 %53 }
  0x83   :  { %vm67_vm4 = vcmp.eq.s32.totalorder %v455_v55, %v60_v50  ;;  %vm68_vm5 = vcmp.eq.s32.totalorder %v48_v11, %v60_v50  ;;  %vm63_vm6 = vcmp.eq.s32.totalorder %v455_v55, %v54_v5  ;;  %vm64_vm7 = vcmp.eq.s32.totalorder %v48_v11, %v54_v5 }
  0x84   :  { %v219_v6 = vsel %vm67_vm4, %v211_v45, %v395_v21  ;;  %v220_v9 = vsel %vm68_vm5, %v212_v46, %v397_v22  ;;  %v215_v10 = vsel %vm63_vm6, %v207_v47, %v399_v23  ;;  %v216_v51 = vsel %vm64_vm7, %v208_v48, %v406_v26 }
  0x85   :  { %v227_v54 = vmul.f32 64.0, %v219_v6  ;;  %v228_v57 = vmul.f32 64.0, %v220_v9  ;;  %v223_v19 = vmul.f32 64.0, %v215_v10  ;;  %v224_v58 = vmul.f32 64.0, %v216_v51 }
  0x87   :  { %235 = vst [vmem:[#allocation5 + $0x30] sm:$0xff] %v227_v54 }
  0x88   :  { %236 = vst [vmem:[#allocation5 + $0x38] sm:$0xff] %v228_v57 }
  0x89   :  { %231 = vst [vmem:[#allocation5 + $0x10] sm:$0xff] %v223_v19 }
  0x8a   :  { %232 = vst [vmem:[#allocation5 + $0x18] sm:$0xff] %v224_v58 }
  0x8b   :  { %249 = dma.vmem_to_hbm [thread:$0]  %s242_s23, 1024, %s244_s26, [#allocation4], %s332_s14, %s332_s14, %s333_s15  }
  0x8c   :  { %329 = dma.done.wait [#allocation4], 1024  }
  0x8d   :  { %330 = vsyncadd [#allocation4], 4294966272 }
  0x8e   :  { %254 = vsyncpa [#allocation3], 1 }
  0x8f   :  { %255 = vsyncpa [#allocation4], 1 }

</bundles_post_ra>
